<compile_context>
chip_gen: v7x
topology: tpu7x:2x2x1
jax: 0.10.0
libtpu: 0.0.40
codegen_flags: <defaults>
</compile_context>

<pallas_src>
import functools

import jax
import jax.numpy as jnp
from jax import lax
from jax.experimental import pallas as pl
from jax.experimental.pallas import tpu as pltpu


def _batch_criterion_kernel(x_bc_ref, x_cb_ref, mask_ref, o_ref, *, T, negM):
    invT = jnp.float32(1.0 / T)
    eps = jnp.float32(1e-12)

    xc = x_cb_ref[...]                      # (C, B): channels on sublanes, batch on lanes
    C, B = xc.shape
    half = B // 2

    # ---- lane-dense L2 normalization (sublane reduce + rsqrt, no divides) ----
    ss_col = jnp.sum(xc * xc, axis=0, keepdims=True)              # (1, B)
    inv_col = lax.rsqrt(ss_col + eps)                              # (1, B)
    xn = xc * inv_col                                              # (C, B)  x/||x||   [K, N]
    xs = xn * invT                                                 # (C, B)  (x/||x||)/T

    # ---- positive pairs: reorder = lane rotate by B/2 ----
    reord = pltpu.roll(xn, shift=half, axis=1)                     # (C, B)
    pos = jnp.exp(jnp.sum(xs * reord, axis=0, keepdims=True))      # (1, B)

    # ---- all-pairs similarity on the MXU as [M,K] x [K,N] ----
    xb = x_bc_ref[...]                                             # (B, C)
    ss_row = jnp.sum(xb * xb, axis=1, keepdims=True)               # (B, 1)
    lhs = xb * (lax.rsqrt(ss_row + eps) * invT)                    # (B, C)  [M, K], 1/T folded
    sim = jnp.exp(jnp.dot(lhs, xn, preferred_element_type=jnp.float32))   # (B, B)
    sim = sim * mask_ref[...]                                      # zero the diagonal (1 - eye)

    # sim is symmetric -> reference row-sums == column-sums; sublane reduce keeps
    # everything lane-aligned with pos.
    all_div = jnp.sum(sim, axis=0, keepdims=True)                  # (1, B)
    if negM != 1.0:
        all_div = (all_div - pos) * negM + pos

    # one EUP approx reciprocal + one Newton step; downstream divides -> VPU muls
    r = pl.reciprocal(all_div, approx=True)
    inv_div = r * (jnp.float32(2.0) - all_div * r)                 # (1, B), ~f32 accurate

    lnPmt = pos * inv_div                                          # (1, B)
    lnPmtsum = jnp.sum(jnp.log(lnPmt), axis=1, keepdims=True)      # (1, 1)

    # sum_i log(1 - sim[i,j] * inv_div[j])  ==  reference's row-j sum (symmetry);
    # masked diagonal contributes log(1) = 0, matching the reference exactly.
    lnq = jnp.sum(jnp.log(1.0 - sim * inv_div), axis=0, keepdims=True)    # (1, B)
    lnPon = lnq - jnp.log(1.0 - lnPmt)                             # (1, B)
    lnPonsum = jnp.sum(lnPon, axis=1, keepdims=True) * negM        # (1, 1)

    o_ref[...] = -(lnPmtsum + lnPonsum) * (1.0 / B)


def batch_criterion(x1, x2, key, *, num_sample_points=64, T=0.1, negM=1.0):
    """Pallas implementation of BatchCriterion.forward.

    x1, x2: (N, C, H, W) feature maps (NCHW, matching the PyTorch module).
    Returns a scalar f32 loss.
    """
    n, c, h, w = x1.shape
    # NCHW -> NHWC -> (N*H*W, C)
    x1f = jnp.transpose(x1, (0, 2, 3, 1)).reshape(n * h * w, c)
    x2f = jnp.transpose(x2, (0, 2, 3, 1)).reshape(n * h * w, c)

    # torch.randperm(...)[:P] equivalent (plain-JAX glue)
    idx = jax.random.permutation(key, n * h * w)[:num_sample_points]
    x = jnp.concatenate([x1f[idx], x2f[idx]], axis=0).astype(jnp.float32)   # (B, C)
    B = 2 * num_sample_points
    xT = x.T                                                                # (C, B) lane-dense
    diag_mat = 1.0 - jnp.eye(B, dtype=jnp.float32)                          # == module's diag_mat

    kernel = functools.partial(_batch_criterion_kernel, T=float(T), negM=float(negM))
    cost = pl.CostEstimate(
        flops=2 * B * B * c + 12 * B * B,
        transcendentals=2 * B * B + 6 * B,
        bytes_accessed=4 * (2 * B * c + B * B + 1),
    )
    out = pl.pallas_call(
        kernel,
        out_shape=jax.ShapeDtypeStruct((1, 1), jnp.float32),
        in_specs=[pl.BlockSpec(memory_space=pltpu.MemorySpace.VMEM)] * 3,
        out_specs=pl.BlockSpec(memory_space=pltpu.MemorySpace.VMEM),
        cost_estimate=cost,
    )(x, xT, diag_mat)
    return out[0, 0]


def _reference_loss(x, T, negM):
    """Pure-jnp reference mirroring the PyTorch code (for correctness check)."""
    B = x.shape[0]
    half = B // 2
    xn = x / jnp.sqrt(jnp.sum(x * x, axis=1, keepdims=True))
    reord = jnp.concatenate([xn[half:], xn[:half]], axis=0)
    pos = jnp.exp(jnp.sum(xn * reord, axis=1) / T)
    sim = jnp.exp(xn @ xn.T / T) * (1.0 - jnp.eye(B, dtype=x.dtype))
    all_div = jnp.sum(sim, axis=1)
    if negM != 1:
        all_div = (all_div - pos) * negM + pos
    lnPmt = pos / all_div
    lnPon = jnp.sum(jnp.log(1.0 - sim / all_div[:, None]), axis=1) - jnp.log(1.0 - lnPmt)
    lnPmtsum = jnp.sum(jnp.log(lnPmt))
    lnPonsum = jnp.sum(lnPon) * negM
    return -(lnPmtsum + lnPonsum) / B


if __name__ == "__main__":
    key = jax.random.PRNGKey(0)
    k1, k2, kperm = jax.random.split(key, 3)

    N, C, H, W = 2, 8, 16, 16          # small NCHW feature maps
    P = 64                             # num_sample_points -> B = 128
    T, negM = 0.1, 1.0

    x1 = jax.random.normal(k1, (N, C, H, W), dtype=jnp.float32)
    x2 = x1 + 0.05 * jax.random.normal(k2, (N, C, H, W), dtype=jnp.float32)

    loss = batch_criterion(x1, x2, kperm, num_sample_points=P, T=T, negM=negM)
    loss = jax.block_until_ready(loss)

    # sanity check against a pure-jnp reference using the same sampled indices
    n, c, h, w = x1.shape
    x1f = jnp.transpose(x1, (0, 2, 3, 1)).reshape(n * h * w, c)
    x2f = jnp.transpose(x2, (0, 2, 3, 1)).reshape(n * h * w, c)
    idx = jax.random.permutation(kperm, n * h * w)[:P]
    x_cat = jnp.concatenate([x1f[idx], x2f[idx]], axis=0)
    ref = _reference_loss(x_cat, T, negM)

    assert jnp.isfinite(loss), "non-finite loss"
    assert jnp.allclose(loss, ref, rtol=1e-3, atol=1e-3), (loss, ref)

    print("KERNEL_OK")
</pallas_src>

<mosaic_0001>
module attributes {stable_mosaic.version = 11 : i64} {
  func.func @_batch_criterion_kernel(%arg0: memref<128x8xf32, #tpu.memory_space<vmem>>, %arg1: memref<8x128xf32, #tpu.memory_space<vmem>>, %arg2: memref<128x128xf32, #tpu.memory_space<vmem>>, %arg3: memref<1x1xf32, #tpu.memory_space<vmem>>) attributes {dimension_semantics = [], scalar_prefetch = 0 : i64, scratch_operands = 0 : i64, tpu.core_type = #tpu.core_type<tc>} {
    %c0 = arith.constant 0 : index
    %c0_0 = arith.constant 0 : index
    %0 = vector.load %arg1[%c0, %c0_0] : memref<8x128xf32, #tpu.memory_space<vmem>>, vector<8x128xf32>
    %1 = arith.mulf %0, %0 : vector<8x128xf32>
    %cst = arith.constant dense<0.000000e+00> : vector<128xf32>
    %2 = vector.multi_reduction <add>, %1, %cst [0] : vector<8x128xf32> to vector<128xf32>
    %3 = vector.shape_cast %2 : vector<128xf32> to vector<1x128xf32>
    %cst_1 = arith.constant 9.99999996E-13 : f32
    %4 = vector.broadcast %cst_1 : f32 to vector<1x128xf32>
    %5 = arith.addf %3, %4 : vector<1x128xf32>
    %6 = math.rsqrt %5 : vector<1x128xf32>
    %7 = vector.broadcast %6 : vector<1x128xf32> to vector<8x128xf32>
    %8 = arith.mulf %0, %7 : vector<8x128xf32>
    %cst_2 = arith.constant 1.000000e+01 : f32
    %9 = vector.broadcast %cst_2 : f32 to vector<8x128xf32>
    %10 = arith.mulf %8, %9 : vector<8x128xf32>
    %c64_i32 = arith.constant 64 : i32
    %11 = tpu.dynamic_rotate %8 by %c64_i32 dim 1 : vector<8x128xf32>, i32 -> vector<8x128xf32>
    %12 = arith.mulf %10, %11 : vector<8x128xf32>
    %cst_3 = arith.constant dense<0.000000e+00> : vector<128xf32>
    %13 = vector.multi_reduction <add>, %12, %cst_3 [0] : vector<8x128xf32> to vector<128xf32>
    %14 = vector.shape_cast %13 : vector<128xf32> to vector<1x128xf32>
    %15 = math.exp %14 : vector<1x128xf32>
    %c0_4 = arith.constant 0 : index
    %c0_5 = arith.constant 0 : index
    %16 = vector.load %arg0[%c0_4, %c0_5] : memref<128x8xf32, #tpu.memory_space<vmem>>, vector<128x8xf32>
    %17 = arith.mulf %16, %16 : vector<128x8xf32>
    %cst_6 = arith.constant dense<0.000000e+00> : vector<128xf32>
    %18 = vector.multi_reduction <add>, %17, %cst_6 [1] : vector<128x8xf32> to vector<128xf32>
    %19 = vector.shape_cast %18 : vector<128xf32> to vector<128x1xf32>
    %cst_7 = arith.constant 9.99999996E-13 : f32
    %20 = vector.broadcast %cst_7 : f32 to vector<128x1xf32>
    %21 = arith.addf %19, %20 : vector<128x1xf32>
    %22 = math.rsqrt %21 : vector<128x1xf32>
    %cst_8 = arith.constant 1.000000e+01 : f32
    %23 = vector.broadcast %cst_8 : f32 to vector<128x1xf32>
    %24 = arith.mulf %22, %23 : vector<128x1xf32>
    %25 = vector.broadcast %24 : vector<128x1xf32> to vector<128x8xf32>
    %26 = arith.mulf %16, %25 : vector<128x8xf32>
    %cst_9 = arith.constant dense<0.000000e+00> : vector<128x128xf32>
    %27 = tpu.matmul %26, %8, %cst_9 {dimension_numbers = #tpu.dot_dimension_numbers<[1], [0], [0], [1], [0, 0, 1, 1], [], []>} : vector<128x8xf32>, vector<8x128xf32>, vector<128x128xf32> -> vector<128x128xf32>
    %28 = math.exp %27 : vector<128x128xf32>
    %c0_10 = arith.constant 0 : index
    %c0_11 = arith.constant 0 : index
    %29 = vector.load %arg2[%c0_10, %c0_11] : memref<128x128xf32, #tpu.memory_space<vmem>>, vector<128x128xf32>
    %30 = arith.mulf %28, %29 : vector<128x128xf32>
    %cst_12 = arith.constant dense<0.000000e+00> : vector<128xf32>
    %31 = vector.multi_reduction <add>, %30, %cst_12 [0] : vector<128x128xf32> to vector<128xf32>
    %32 = vector.shape_cast %31 : vector<128xf32> to vector<1x128xf32>
    %33 = tpu.reciprocal %32 {approx = true} : vector<1x128xf32> -> vector<1x128xf32>
    %34 = arith.mulf %32, %33 : vector<1x128xf32>
    %cst_13 = arith.constant 2.000000e+00 : f32
    %35 = vector.broadcast %cst_13 : f32 to vector<1x128xf32>
    %36 = arith.subf %35, %34 : vector<1x128xf32>
    %37 = arith.mulf %33, %36 : vector<1x128xf32>
    %38 = arith.mulf %15, %37 : vector<1x128xf32>
    %39 = math.log %38 : vector<1x128xf32>
    %cst_14 = arith.constant dense<0.000000e+00> : vector<1xf32>
    %40 = vector.multi_reduction <add>, %39, %cst_14 [1] : vector<1x128xf32> to vector<1xf32>
    %41 = vector.shape_cast %40 : vector<1xf32> to vector<1x1xf32>
    %42 = vector.broadcast %37 : vector<1x128xf32> to vector<128x128xf32>
    %43 = arith.mulf %30, %42 : vector<128x128xf32>
    %cst_15 = arith.constant 1.000000e+00 : f32
    %44 = vector.broadcast %cst_15 : f32 to vector<128x128xf32>
    %45 = arith.subf %44, %43 : vector<128x128xf32>
    %46 = math.log %45 : vector<128x128xf32>
    %cst_16 = arith.constant dense<0.000000e+00> : vector<128xf32>
    %47 = vector.multi_reduction <add>, %46, %cst_16 [0] : vector<128x128xf32> to vector<128xf32>
    %48 = vector.shape_cast %47 : vector<128xf32> to vector<1x128xf32>
    %cst_17 = arith.constant 1.000000e+00 : f32
    %49 = vector.broadcast %cst_17 : f32 to vector<1x128xf32>
    %50 = arith.subf %49, %38 : vector<1x128xf32>
    %51 = math.log %50 : vector<1x128xf32>
    %52 = arith.subf %48, %51 : vector<1x128xf32>
    %cst_18 = arith.constant dense<0.000000e+00> : vector<1xf32>
    %53 = vector.multi_reduction <add>, %52, %cst_18 [1] : vector<1x128xf32> to vector<1xf32>
    %54 = vector.shape_cast %53 : vector<1xf32> to vector<1x1xf32>
    %cst_19 = arith.constant 1.000000e+00 : f32
    %55 = vector.broadcast %cst_19 : f32 to vector<1x1xf32>
    %56 = arith.mulf %54, %55 : vector<1x1xf32>
    %57 = arith.addf %41, %56 : vector<1x1xf32>
    %cst_20 = arith.constant 0.000000e+00 : f32
    %58 = vector.broadcast %cst_20 : f32 to vector<1x1xf32>
    %59 = arith.subf %58, %57 : vector<1x1xf32>
    %cst_21 = arith.constant 7.812500e-03 : f32
    %60 = vector.broadcast %cst_21 : f32 to vector<1x1xf32>
    %61 = arith.mulf %59, %60 : vector<1x1xf32>
    %c0_22 = arith.constant 0 : index
    %c0_23 = arith.constant 0 : index
    %62 = vector.load %arg3[%c0_22, %c0_23] : memref<1x1xf32, #tpu.memory_space<vmem>>, vector<1x1xf32>
    tpu.vector_store %arg3[%c0_22, %c0_23], %61 {strides = array<i32>} : memref<1x1xf32, #tpu.memory_space<vmem>>, vector<1x1xf32>,
    return
  }
}

</mosaic_0001>

<bundles_post_ra>
// kernel: tpu_custom_call.1
= control target key start
LH: loop header
LB: loop body
LE: loop exit
PB: predicated region body
PF: predicated region fallthrough
CT: control target
= control target key end

     0   :  { %vm70_vm0 = vcmask 64512   ;;  %s1069_s0 = inlined_call_operand.vmem [shape: f32[128,8], index: 0, kind: input, shape index: {}]   ;;  %s1070_s1 = inlined_call_operand.vmem [shape: f32[8,128], index: 1, kind: input, shape index: {}]   ;;  %s1071_s2 = inlined_call_operand.vmem [shape: f32[128,128], index: 2, kind: input, shape index: {}]   ;;  %s1072_s3 = inlined_call_operand.hbm [shape: f32[1,1], index: 3, kind: output, shape index: {}]  }
   0x1   :  { %v798_v0 = vld [vmem:[%s1069_s0] sm:$0xff]  ;;  %v803_v1 = vld [vmem:[%s1069_s0 + $0x10] sm:$0xff]  ;;  %v808_v2 = vld [vmem:[%s1069_s0 + $0x8] sm:$0xff] }
   0x2   :  { %v54_v3 = vmul.f32 %v798_v0, %v798_v0  ;;  %v56_v4 = vmul.f32 %v803_v1, %v803_v1  ;;  %v55_v5 = vmul.f32 %v808_v2, %v808_v2  ;;  %v819_v6 = vld [vmem:[%s1069_s0 + $0x18] sm:$0xff]  ;;  %v826_v8 = vld [vmem:[%s1069_s0 + $0x20] sm:$0xff]  ;;  %v831_v9 = vld [vmem:[%s1069_s0 + $0x28] sm:$0xff] }
   0x3   :  { %v57_v7 = vmul.f32 %v819_v6, %v819_v6  ;;  %v58_v14 = vmul.f32 %v826_v8, %v826_v8  ;;  %v59_v15 = vmul.f32 %v831_v9, %v831_v9  ;;  %v844_v16 = vld [vmem:[%s1069_s0 + $0x30] sm:$0xff] }
   0x4   :  { %v71_v10 = vsel %vm70_vm0, %v54_v3, 0.0  ;;  %v77_v11 = vsel %vm70_vm0, %v56_v4, 0.0  ;;  %v74_v12 = vsel %vm70_vm0, %v55_v5, 0.0 }
   0x5   :  { %72 = vadd.xlane.f32.xlu0 %v71_v10  ;;  %78 = vadd.xlane.f32.xlu1 %v77_v11  ;;  %v80_v13 = vsel %vm70_vm0, %v57_v7, 0.0 }
   0x6   :  { %8 = vsyncpa [#allocation3], 0  ;;  %v849_v17 = vld [vmem:[%s1069_s0 + $0x38] sm:$0xff]  ;;  %v15_v18 = vld [vmem:[%s1070_s1] sm:$0xff]  ;;  %v60_v19 = vmul.f32 %v844_v16, %v844_v16  ;;  %v83_v20 = vsel %vm70_vm0, %v58_v14, 0.0  ;;  %v86_v21 = vsel %vm70_vm0, %v59_v15, 0.0 }
   0x7   :  { %v61_v22 = vmul.f32 %v849_v17, %v849_v17  ;;  %v16_v23 = vmul.f32 %v15_v18, %v15_v18  ;;  %v863_v24 = vld [vmem:[%s1069_s0 + $0x40] sm:$0xff]  ;;  %v868_v25 = vld [vmem:[%s1069_s0 + $0x48] sm:$0xff]  ;;  %v879_v31 = vld [vmem:[%s1069_s0 + $0x50] sm:$0xff]  ;;  %vm564_vm1 = vcmask 0  }
   0x8   :  { %v89_v27 = vsel %vm70_vm0, %v60_v19, 0.0  ;;  %v62_v29 = vmul.f32 %v863_v24, %v863_v24  ;;  %v63_v30 = vmul.f32 %v868_v25, %v868_v25  ;;  %v884_v33 = vld [vmem:[%s1069_s0 + $0x58] sm:$0xff]  ;;  %v64_v35 = vmul.f32 %v879_v31, %v879_v31  ;;  %v895_v39 = vld [vmem:[%s1069_s0 + $0x60] sm:$0xff]  ;;  %v900_v41 = vld [vmem:[%s1069_s0 + $0x68] sm:$0xff] }
   0x9   :  { %75 = vadd.xlane.f32.xlu0 %v74_v12  ;;  %81 = vadd.xlane.f32.xlu1 %v80_v13  ;;  %v17_v26 = vrot.slane %v16_v23, 4  ;;  %v92_v28 = vsel %vm70_vm0, %v61_v22, 0.0  ;;  %v65_v38 = vmul.f32 %v884_v33, %v884_v33  ;;  %v66_v43 = vmul.f32 %v895_v39, %v895_v39  ;;  %v911_v47 = vld [vmem:[%s1069_s0 + $0x70] sm:$0xff]  ;;  %v916_v49 = vld [vmem:[%s1069_s0 + $0x78] sm:$0xff]  ;;  %s773_s0 = smov 64  }
   0xa   :  { %v95_v36 = vsel %vm70_vm0, %v62_v29, 0.0  ;;  %v98_v37 = vsel %vm70_vm0, %v63_v30, 0.0  ;;  %v101_v44 = vsel %vm70_vm0, %v64_v35, 0.0  ;;  %v67_v46 = vmul.f32 %v900_v41, %v900_v41 }
   0xb   :  { %v18_v32 = vadd.f32 %v17_v26, %v16_v23  ;;  %v104_v45 = vsel %vm70_vm0, %v65_v38, 0.0  ;;  %v68_v51 = vmul.f32 %v911_v47, %v911_v47  ;;  %v107_v52 = vsel %vm70_vm0, %v66_v43, 0.0 }
   0xc   :  { %v110_v53 = vsel %vm70_vm0, %v67_v46, 0.0  ;;  %v69_v54 = vmul.f32 %v916_v49, %v916_v49 }
   0xd   :  { %84 = vadd.xlane.f32.xlu0 %v83_v20  ;;  %87 = vadd.xlane.f32.xlu1 %v86_v21  ;;  %v19_v34 = vrot.slane %v18_v32, 2  ;;  %v113_v55 = vsel %vm70_vm0, %v68_v51, 0.0 }
   0xe   :  { %v116_v56 = vsel %vm70_vm0, %v69_v54, 0.0 }
   0xf   :  { %v20_v40 = vadd.f32 %v19_v34, %v18_v32 }
  0x11   :  { %90 = vadd.xlane.f32.xlu0 %v89_v27  ;;  %93 = vadd.xlane.f32.xlu1 %v92_v28  ;;  %v21_v42 = vrot.slane %v20_v40, 1 }
  0x13   :  { %v22_v48 = vadd.f32 %v21_v42, %v20_v40 }
  0x15   :  { %96 = vadd.xlane.f32.xlu0 %v95_v36  ;;  %99 = vadd.xlane.f32.xlu1 %v98_v37  ;;  %v23_v50 = vadd.f32 1e-12, %v22_v48 }
  0x17   :  { %643 = vrsqrt.f32 %v23_v50 }
  0x19   :  { %102 = vadd.xlane.f32.xlu0 %v101_v44  ;;  %105 = vadd.xlane.f32.xlu1 %v104_v45 }
  0x1d   :  { %108 = vadd.xlane.f32.xlu0 %v107_v52  ;;  %111 = vadd.xlane.f32.xlu1 %v110_v53 }
  0x21   :  { %114 = vadd.xlane.f32.xlu0 %v113_v55  ;;  %117 = vadd.xlane.f32.xlu1 %v116_v56  ;;  %v644_v57 = vpop.eup %643 }
  0x22   :  { %v926_v58 = vmul.f32 %v644_v57, %v15_v18 }
  0x24   :  { %613 = vmatprep.subr.mxu0 %v926_v58  ;;  %639 = vmatprep.subr.mxu1 %v926_v58 }
  0x25   :  { %614 = vmatpush3.msra.mxu0 %v926_v58  ;;  %640 = vmatpush3.msra.mxu1 %v926_v58 }
  0x37   :  { %27 = vrot.lane.b32.xlu0 %v926_v58, %s773_s0 }
  0x92   :  { %v73_v59 = vpop.xlane.xlu0 %72  ;;  %v79_v60 = vpop.xlane.xlu1 %78 }
  0x93   :  { %v119_v61 = vadd.f32 1e-12, %v73_v59  ;;  %v121_v62 = vadd.f32 1e-12, %v79_v60 }
  0x95   :  { %645 = vrsqrt.f32 %v119_v61 }
  0x96   :  { %647 = vrsqrt.f32 %v121_v62  ;;  %v76_v63 = vpop.xlane.xlu0 %75  ;;  %v82_v3 = vpop.xlane.xlu1 %81 }
  0x97   :  { %v120_v4 = vadd.f32 1e-12, %v76_v63  ;;  %v122_v5 = vadd.f32 1e-12, %v82_v3 }
  0x99   :  { %649 = vrsqrt.f32 %v120_v4 }
  0x9a   :  { %651 = vrsqrt.f32 %v122_v5  ;;  %v85_v7 = vpop.xlane.xlu0 %84  ;;  %v88_v10 = vpop.xlane.xlu1 %87 }
  0x9b   :  { %v123_v11 = vadd.f32 1e-12, %v85_v7  ;;  %v124_v12 = vadd.f32 1e-12, %v88_v10 }
  0x9d   :  { %653 = vrsqrt.f32 %v123_v11 }
  0x9e   :  { %655 = vrsqrt.f32 %v124_v12  ;;  %v91_v13 = vpop.xlane.xlu0 %90  ;;  %v94_v14 = vpop.xlane.xlu1 %93 }
  0x9f   :  { %v646_v15 = vpop.eup %645  ;;  %v125_v18 = vadd.f32 1e-12, %v91_v13  ;;  %v126_v19 = vadd.f32 1e-12, %v94_v14 }
  0xa0   :  { %v648_v20 = vpop.eup %647  ;;  %v151_v21 = vmul.f32 10.0, %v646_v15 }
  0xa1   :  { %v153_v22 = vmul.f32 10.0, %v648_v20  ;;  %657 = vrsqrt.f32 %v125_v18 }
  0xa2   :  { %659 = vrsqrt.f32 %v126_v19  ;;  %v167_v23 = vmul.f32 %v151_v21, %v798_v0  ;;  %v97_v26 = vpop.xlane.xlu0 %96  ;;  %v100_v27 = vpop.xlane.xlu1 %99 }
  0xa3   :  { %v650_v28 = vpop.eup %649  ;;  %v127_v29 = vadd.f32 1e-12, %v97_v26  ;;  %v128_v30 = vadd.f32 1e-12, %v100_v27  ;;  %v169_v35 = vmul.f32 %v153_v22, %v803_v1 }
  0xa4   :  { %v652_v32 = vpop.eup %651  ;;  %v152_v34 = vmul.f32 10.0, %v650_v28  ;;  %615 = vmatprep.mubr.msk.f32.mxu0 %vm70_vm0, %v167_v23 }
  0xa5   :  { %v154_v36 = vmul.f32 10.0, %v652_v32  ;;  %661 = vrsqrt.f32 %v127_v29 }
  0xa6   :  { %v168_v37 = vmul.f32 %v152_v34, %v808_v2  ;;  %663 = vrsqrt.f32 %v128_v30  ;;  %v103_v38 = vpop.xlane.xlu0 %102  ;;  %v106_v40 = vpop.xlane.xlu1 %105 }
  0xa7   :  { %v654_v42 = vpop.eup %653  ;;  %v129_v0 = vadd.f32 1e-12, %v103_v38  ;;  %v130_v43 = vadd.f32 1e-12, %v106_v40  ;;  %v170_v45 = vmul.f32 %v154_v36, %v819_v6  ;;  %v409_v36 = vld [vmem:[%s1071_s2 + $0x8] sm:$0xff] }
  0xa8   :  { %v656_v44 = vpop.eup %655  ;;  %v155_v46 = vmul.f32 10.0, %v654_v42  ;;  %616 = vmatmul.mubr.msk.f32.vlgmr.msra.gmra.mrb[0].mxu0 %vm70_vm0, %v168_v37  ;;  %v408_v37 = vld [vmem:[%s1071_s2] sm:$0xff] }
  0xa9   :  { %v156_v48 = vmul.f32 10.0, %v656_v44  ;;  %665 = vrsqrt.f32 %v129_v0  ;;  %618 = vmatprep.mubr.msk.f32.mxu0 %vm70_vm0, %v169_v35 }
  0xaa   :  { %v171_v1 = vmul.f32 %v155_v46, %v826_v8  ;;  %667 = vrsqrt.f32 %v130_v43  ;;  %v109_v2 = vpop.xlane.xlu0 %108  ;;  %v112_v50 = vpop.xlane.xlu1 %111 }
  0xab   :  { %v658_v51 = vpop.eup %657  ;;  %v131_v52 = vadd.f32 1e-12, %v109_v2  ;;  %v132_v53 = vadd.f32 1e-12, %v112_v50  ;;  %v172_v55 = vmul.f32 %v156_v48, %v831_v9  ;;  %v410_v50 = vld [vmem:[%s1071_s2 + $0x10] sm:$0xff] }
  0xac   :  { %v660_v54 = vpop.eup %659  ;;  %v157_v56 = vmul.f32 10.0, %v658_v51  ;;  %619 = vmatmul.mubr.msk.f32.gmra.mrb[2].mxu0 %vm70_vm0, %v170_v45 }
  0xad   :  { %v158_v6 = vmul.f32 10.0, %v660_v54  ;;  %669 = vrsqrt.f32 %v131_v52  ;;  %621 = vmatprep.mubr.msk.f32.mxu0 %vm70_vm0, %v171_v1 }
  0xae   :  { %v173_v57 = vmul.f32 %v157_v56, %v844_v16  ;;  %671 = vrsqrt.f32 %v132_v53  ;;  %v115_v8 = vpop.xlane.xlu0 %114  ;;  %v118_v59 = vpop.xlane.xlu1 %117  ;;  %v411_v56 = vld [vmem:[%s1071_s2 + $0x18] sm:$0xff] }
  0xaf   :  { %v662_v60 = vpop.eup %661  ;;  %v133_v61 = vadd.f32 1e-12, %v115_v8  ;;  %v134_v62 = vadd.f32 1e-12, %v118_v59  ;;  %v174_v3 = vmul.f32 %v158_v6, %v849_v17  ;;  %v412_v59 = vld [vmem:[%s1071_s2 + $0x20] sm:$0xff] }
  0xb0   :  { %v664_v63 = vpop.eup %663  ;;  %622 = vmatmul.mubr.msk.f32.gmra.mrb[4].mxu0 %vm70_vm0, %v172_v55  ;;  %v159_v9 = vmul.f32 10.0, %v662_v60 }
  0xb1   :  { %v160_v4 = vmul.f32 10.0, %v664_v63  ;;  %673 = vrsqrt.f32 %v133_v61  ;;  %624 = vmatprep.mubr.msk.f32.mxu0 %vm70_vm0, %v173_v57 }
  0xb2   :  { %675 = vrsqrt.f32 %v134_v62  ;;  %v175_v5 = vmul.f32 %v159_v9, %v863_v24 }
  0xb3   :  { %v666_v16 = vpop.eup %665  ;;  %v176_v7 = vmul.f32 %v160_v4, %v868_v25  ;;  %v413_v4 = vld [vmem:[%s1071_s2 + $0x28] sm:$0xff] }
  0xb4   :  { %v668_v10 = vpop.eup %667  ;;  %v161_v11 = vmul.f32 10.0, %v666_v16  ;;  %625 = vmatmul.mubr.msk.f32.gmra.mrb[6].mxu0 %vm70_vm0, %v174_v3  ;;  %627 = vmatprep.mubr.msk.f32.mxu1 %vm70_vm0, %v175_v5 }
  0xb5   :  { %v162_v17 = vmul.f32 10.0, %v668_v10  ;;  %628 = vmatmul.mubr.msk.f32.vlgmr.msra.gmra.mrb[0].mxu1 %vm70_vm0, %v176_v7 }
  0xb6   :  { %v177_v12 = vmul.f32 %v161_v11, %v879_v31  ;;  %v414_v11 = vld [vmem:[%s1071_s2 + $0x30] sm:$0xff] }
  0xb7   :  { %v670_v13 = vpop.eup %669  ;;  %v178_v14 = vmul.f32 %v162_v17, %v884_v33 }
  0xb8   :  { %v672_v15 = vpop.eup %671  ;;  %v163_v18 = vmul.f32 10.0, %v670_v13  ;;  %630 = vmatprep.mubr.msk.f32.mxu1 %vm70_vm0, %v177_v12 }
  0xb9   :  { %v164_v24 = vmul.f32 10.0, %v672_v15  ;;  %631 = vmatmul.mubr.msk.f32.gmra.mrb[2].mxu1 %vm70_vm0, %v178_v14 }
  0xba   :  { %v179_v25 = vmul.f32 %v163_v18, %v895_v39 }
  0xbb   :  { %v674_v19 = vpop.eup %673  ;;  %v180_v20 = vmul.f32 %v164_v24, %v900_v41  ;;  %v415_v24 = vld [vmem:[%s1071_s2 + $0x38] sm:$0xff] }
  0xbc   :  { %v676_v21 = vpop.eup %675  ;;  %v165_v22 = vmul.f32 10.0, %v674_v19  ;;  %633 = vmatprep.mubr.msk.f32.mxu1 %vm70_vm0, %v179_v25  ;;  %v416_v25 = vld [vmem:[%s1071_s2 + $0x40] sm:$0xff] }
  0xbd   :  { %v166_v31 = vmul.f32 10.0, %v676_v21  ;;  %634 = vmatmul.mubr.msk.f32.gmra.mrb[4].mxu1 %vm70_vm0, %v180_v20 }
  0xbe   :  { %v181_v33 = vmul.f32 %v165_v22, %v911_v47 }
  0xbf   :  { %v182_v23 = vmul.f32 %v166_v31, %v916_v49 }
  0xc0   :  { %636 = vmatprep.mubr.msk.f32.mxu1 %vm70_vm0, %v181_v33 }
  0xc1   :  { %637 = vmatmul.mubr.msk.f32.gmra.mrb[6].mxu1 %vm70_vm0, %v182_v23  ;;  %v26_v23 = vmul.f32 10.0, %v926_v58 }
 0x17b   :  { %v617_v26 = vpop.f32.mrb[0].mxu0 }
 0x17c   :  { %v378_v39 = vmul.f32 1.442695, %v617_v26  ;;  %v297_v27 = vpop.f32.mrb[1].mxu0 }
 0x17d   :  { %v376_v28 = vmul.f32 1.442695, %v297_v27 }
 0x17e   :  { %677 = vpow2.f32 %v378_v39 }
 0x17f   :  { %679 = vpow2.f32 %v376_v28  ;;  %v620_v41 = vpop.f32.mrb[2].mxu0 }
 0x180   :  { %v382_v29 = vmul.f32 1.442695, %v620_v41  ;;  %v307_v30 = vpop.f32.mrb[3].mxu0  ;;  %v417_v41 = vld [vmem:[%s1071_s2 + $0x48] sm:$0xff] }
 0x181   :  { %v380_v32 = vmul.f32 1.442695, %v307_v30  ;;  %v28_v30 = vpop.permute.xlu0 %27 }
 0x182   :  { %681 = vpow2.f32 %v382_v29  ;;  %v418_v29 = vld [vmem:[%s1071_s2 + $0x50] sm:$0xff] }
 0x183   :  { %683 = vpow2.f32 %v380_v32  ;;  %v623_v34 = vpop.f32.mrb[4].mxu0 }
 0x184   :  { %v386_v47 = vmul.f32 1.442695, %v623_v34  ;;  %v317_v35 = vpop.f32.mrb[5].mxu0 }
 0x185   :  { %v384_v49 = vmul.f32 1.442695, %v317_v35 }
 0x186   :  { %685 = vpow2.f32 %v386_v47 }
 0x187   :  { %687 = vpow2.f32 %v384_v49  ;;  %v626_v38 = vpop.f32.mrb[6].mxu0  ;;  %v29_v49 = vmul.f32 %v28_v30, %v26_v23 }
 0x188   :  { %v678_v40 = vpop.eup %677  ;;  %v390_v42 = vmul.f32 1.442695, %v626_v38  ;;  %v327_v0 = vpop.f32.mrb[7].mxu0  ;;  %v420_v38 = vld [vmem:[%s1071_s2 + $0x60] sm:$0xff] }
 0x189   :  { %v629_v43 = vpop.f32.mrb[0].mxu1  ;;  %v680_v44 = vpop.eup %679  ;;  %v971_v45 = vmul.f32 %v678_v40, %v409_v36  ;;  %v388_v46 = vmul.f32 1.442695, %v327_v0 }
 0x18a   :  { %v337_v48 = vpop.f32.mrb[1].mxu1  ;;  %v973_v1 = vmul.f32 %v680_v44, %v408_v37  ;;  %689 = vpow2.f32 %v390_v42  ;;  %v394_v51 = vmul.f32 1.442695, %v629_v43  ;;  %v419_v37 = vld [vmem:[%s1071_s2 + $0x58] sm:$0xff] }
 0x18b   :  { %v392_v2 = vmul.f32 1.442695, %v337_v48  ;;  %691 = vpow2.f32 %v388_v46  ;;  %v30_v46 = vrot.slane %v29_v49, 4 }
 0x18c   :  { %v682_v52 = vpop.eup %681  ;;  %v440_v53 = vadd.f32 %v971_v45, %v973_v1  ;;  %v632_v54 = vpop.f32.mrb[2].mxu1 }
 0x18d   :  { %v684_v55 = vpop.eup %683  ;;  %693 = vpow2.f32 %v392_v2  ;;  %v347_v6 = vpop.f32.mrb[3].mxu1  ;;  %v398_v60 = vmul.f32 1.442695, %v632_v54  ;;  %v988_v62 = vmul.f32 %v682_v52, %v411_v56  ;;  %v421_v2 = vld [vmem:[%s1071_s2 + $0x68] sm:$0xff]  ;;  %v31_v56 = vadd.f32 %v30_v46, %v29_v49 }
 0x18e   :  { %v983_v57 = vmul.f32 %v684_v55, %v410_v50  ;;  %v396_v8 = vmul.f32 1.442695, %v347_v6  ;;  %695 = vpow2.f32 %v394_v51  ;;  %v422_v50 = vld [vmem:[%s1071_s2 + $0x70] sm:$0xff] }
 0x190   :  { %v686_v61 = vpop.eup %685  ;;  %v441_v63 = vadd.f32 %v440_v53, %v983_v57  ;;  %697 = vpow2.f32 %v396_v8  ;;  %v635_v3 = vpop.f32.mrb[4].mxu1  ;;  %v423_v8 = vld [vmem:[%s1071_s2 + $0x78] sm:$0xff]  ;;  %s774_s2 = smov [#allocation2]  }
 0x191   :  { %v688_v9 = vpop.eup %687  ;;  %v357_v5 = vpop.f32.mrb[5].mxu1  ;;  %699 = vpow2.f32 %v398_v60  ;;  %v402_v17 = vmul.f32 1.442695, %v635_v3  ;;  %v1000_v13 = vmul.f32 %v686_v61, %v413_v4  ;;  %s572_s21 = sshll.u32 %s774_s2, 4  ;;  %s573_s21 = int_to_ptr.vmem [resolvable:$true] %s572_s21 }
 0x192   :  { %v994_v16 = vmul.f32 %v688_v9, %v412_v59  ;;  %v442_v7 = vadd.f32 %v441_v63, %v988_v62  ;;  %v400_v10 = vmul.f32 1.442695, %v357_v5  ;;  %v32_v63 = vrot.slane %v31_v56, 2  ;;  %s749_s22 = scalar_lea.vmem %s573_s21, 16  ;;  %s753_s23 = scalar_lea.vmem %s573_s21, 32 }
 0x193   :  { %p750_p0 = scmp.ne.s32.totalorder %s573_s21, %s749_s22  ;;  %p754_p1 = scmp.lt.s32.totalorder %s573_s21, %s573_s21 }
 0x194   :  { %v690_v12 = vpop.eup %689  ;;  %v443_v14 = vadd.f32 %v442_v7, %v994_v16  ;;  %701 = vpow2.f32 %v400_v10  ;;  %v638_v15 = vpop.f32.mrb[6].mxu1  ;;  %v33_v4 = vadd.f32 %v32_v63, %v31_v56  ;;  %p755_p2 = scmp.lt.s32.totalorder %s753_s23, %s749_s22 }
 0x195   :  { %v692_v18 = vpop.eup %691  ;;  %v367_v19 = vpop.f32.mrb[7].mxu1  ;;  %703 = vpow2.f32 %v402_v17  ;;  %v406_v33 = vmul.f32 1.442695, %v638_v15  ;;  %v1013_v26 = vmul.f32 %v690_v12, %v415_v24 }
 0x196   :  { %v1009_v20 = vmul.f32 %v692_v18, %v414_v11  ;;  %v444_v21 = vadd.f32 %v443_v14, %v1000_v13  ;;  %v404_v22 = vmul.f32 1.442695, %v367_v19  ;;  %v34_v10 = vrot.slane %v33_v4, 1  ;;  %p756_p3 = por %p755_p2, %p754_p1 }
 0x197   :  { %v694_v31 = vpop.eup %693 }
 0x198   :  { %v445_v39 = vadd.f32 %v444_v21, %v1009_v20  ;;  %v1016_v27 = vmul.f32 %v694_v31, %v416_v25  ;;  %705 = vpow2.f32 %v404_v22  ;;  %v696_v28 = vpop.eup %695  ;;  %v35_v12 = vadd.f32 %v34_v10, %v33_v4  ;;  %p757_p4 = pnand %p756_p3, %p750_p0 }
 0x199   :  { %707 = vpow2.f32 %v406_v33  ;;  %v433_v34 = vmul.f32 %v696_v28, %v417_v41 }
 0x19a   :  { %v698_v32 = vpop.eup %697  ;;  %v446_v58 = vadd.f32 %v445_v39, %v1013_v26  ;;  %v36_v15 = vmul.f32 1.442695, %v35_v12 }
 0x19b   :  { %v434_v35 = vmul.f32 %v698_v32, %v418_v29  ;;  %v700_v36 = vpop.eup %699 }
 0x19c   :  { %v447_v47 = vadd.f32 %v446_v58, %v1016_v27  ;;  %v435_v0 = vmul.f32 %v700_v36, %v419_v37 }
 0x19e   :  { %v702_v40 = vpop.eup %701  ;;  %v448_v42 = vadd.f32 %v447_v47, %v433_v34 }
 0x19f   :  { %v436_v44 = vmul.f32 %v702_v40, %v420_v38  ;;  %v704_v48 = vpop.eup %703 }
 0x1a0   :  { %v449_v43 = vadd.f32 %v448_v42, %v434_v35  ;;  %v437_v53 = vmul.f32 %v704_v48, %v421_v2 }
 0x1a2   :  { %v706_v51 = vpop.eup %705  ;;  %v450_v52 = vadd.f32 %v449_v43, %v435_v0 }
 0x1a3   :  { %v438_v55 = vmul.f32 %v706_v51, %v422_v50  ;;  %v708_v6 = vpop.eup %707 }
 0x1a4   :  { %v451_v54 = vadd.f32 %v450_v52, %v436_v44  ;;  %v439_v60 = vmul.f32 %v708_v6, %v423_v8 }
 0x1a6   :  { %v452_v59 = vadd.f32 %v451_v54, %v437_v53 }
 0x1a8   :  { %v453_v61 = vadd.f32 %v452_v59, %v438_v55 }
 0x1aa   :  { %v454_v3 = vadd.f32 %v453_v61, %v439_v60 }
 0x1ac   :  { %v455_v9 = vrot.slane %v454_v3, 4 }
 0x1ae   :  { %v456_v5 = vadd.f32 %v455_v9, %v454_v3 }
 0x1b0   :  { %v457_v7 = vrot.slane %v456_v5, 2 }
 0x1b2   :  { %v458_v11 = vadd.f32 %v457_v7, %v456_v5 }
 0x1b4   :  { %v459_v17 = vrot.slane %v458_v11, 1 }
 0x1b6   :  { %v460_v14 = vadd.f32 %v459_v17, %v458_v11 }
 0x1b8   :  { %709 = vrcp.f32 %v460_v14 }
 0x1b9   :  { %711 = vpow2.f32 %v36_v15 }
 0x1c2   :  { %v710_v18 = vpop.eup %709 }
 0x1c3   :  { %v462_v24 = vmul.f32 %v710_v18, %v460_v14  ;;  %v712_v19 = vpop.eup %711 }
 0x1c5   :  { %v463_v25 = vsub.f32 2.0, %v462_v24 }
 0x1c7   :  { %v464_v21 = vmul.f32 %v710_v18, %v463_v25 }
 0x1c9   :  { %v1041_v22 = vmul.f32 %v464_v21, %v438_v55  ;;  %v1043_v31 = vmul.f32 %v712_v19, %v464_v21  ;;  %v470_v33 = vmul.f32 %v464_v21, %v973_v1  ;;  %v471_v23 = vmul.f32 %v464_v21, %v971_v45 }
 0x1ca   :  { %v472_v39 = vmul.f32 %v464_v21, %v983_v57  ;;  %v473_v28 = vmul.f32 %v464_v21, %v988_v62  ;;  %v474_v41 = vmul.f32 %v464_v21, %v994_v16  ;;  %v475_v29 = vmul.f32 %v464_v21, %v1000_v13 }
 0x1cb   :  { %713 = vlog2.f32 %v1043_v31  ;;  %v476_v30 = vmul.f32 %v464_v21, %v1009_v20  ;;  %v477_v32 = vmul.f32 %v464_v21, %v1013_v26  ;;  %v478_v58 = vmul.f32 %v464_v21, %v1016_v27 }
 0x1cc   :  { %v479_v47 = vmul.f32 %v464_v21, %v433_v34  ;;  %v480_v1 = vmul.f32 %v464_v21, %v434_v35  ;;  %v481_v49 = vmul.f32 %v464_v21, %v435_v0  ;;  %v482_v45 = vmul.f32 %v464_v21, %v436_v44 }
 0x1cd   :  { %v483_v36 = vmul.f32 %v464_v21, %v437_v53  ;;  %v485_v57 = vmul.f32 %v464_v21, %v439_v60  ;;  %v486_v37 = vsub.f32 1.0, %v470_v33  ;;  %v487_v62 = vsub.f32 1.0, %v471_v23 }
 0x1ce   :  { %v488_v38 = vsub.f32 1.0, %v472_v39  ;;  %v489_v16 = vsub.f32 1.0, %v473_v28  ;;  %v490_v13 = vsub.f32 1.0, %v474_v41  ;;  %v491_v40 = vsub.f32 1.0, %v475_v29 }
 0x1cf   :  { %715 = vlog2.f32 %v486_v37  ;;  %v492_v42 = vsub.f32 1.0, %v476_v30  ;;  %v493_v27 = vsub.f32 1.0, %v477_v32  ;;  %v494_v34 = vsub.f32 1.0, %v478_v58 }
 0x1d0   :  { %717 = vlog2.f32 %v487_v62  ;;  %v495_v43 = vsub.f32 1.0, %v479_v47  ;;  %v496_v50 = vsub.f32 1.0, %v480_v1  ;;  %v497_v54 = vsub.f32 1.0, %v481_v49 }
 0x1d1   :  { %719 = vlog2.f32 %v488_v38  ;;  %v498_v8 = vsub.f32 1.0, %v482_v45  ;;  %v499_v63 = vsub.f32 1.0, %v483_v36  ;;  %v500_v5 = vsub.f32 1.0, %v1041_v22 }
 0x1d2   :  { %721 = vlog2.f32 %v489_v16  ;;  %v501_v17 = vsub.f32 1.0, %v485_v57  ;;  %v555_v45 = vsub.f32 1.0, %v1043_v31 }
 0x1d3   :  { %723 = vlog2.f32 %v490_v13 }
 0x1d4   :  { %725 = vlog2.f32 %v491_v40 }
 0x1d5   :  { %v714_v20 = vpop.eup %713  ;;  %727 = vlog2.f32 %v492_v42 }
 0x1d6   :  { %v467_v26 = vmul.f32 0.6931472, %v714_v20  ;;  %729 = vlog2.f32 %v493_v27 }
 0x1d7   :  { %731 = vlog2.f32 %v494_v34 }
 0x1d8   :  { %468 = vadd.xlane.f32.xlu1 %v467_v26  ;;  %733 = vlog2.f32 %v495_v43 }
 0x1d9   :  { %v716_v35 = vpop.eup %715  ;;  %735 = vlog2.f32 %v496_v50 }
 0x1da   :  { %v718_v0 = vpop.eup %717  ;;  %v503_v44 = vmul.f32 0.6931472, %v716_v35  ;;  %737 = vlog2.f32 %v497_v54 }
 0x1db   :  { %v720_v46 = vpop.eup %719  ;;  %v505_v48 = vmul.f32 0.6931472, %v718_v0  ;;  %739 = vlog2.f32 %v498_v8 }
 0x1dc   :  { %v722_v2 = vpop.eup %721  ;;  %v507_v51 = vmul.f32 0.6931472, %v720_v46  ;;  %741 = vlog2.f32 %v499_v63 }
 0x1dd   :  { %v534_v52 = vadd.f32 %v505_v48, %v503_v44  ;;  %v724_v53 = vpop.eup %723  ;;  %v509_v55 = vmul.f32 0.6931472, %v722_v2  ;;  %743 = vlog2.f32 %v500_v5 }
 0x1de   :  { %v726_v6 = vpop.eup %725  ;;  %v511_v59 = vmul.f32 0.6931472, %v724_v53  ;;  %745 = vlog2.f32 %v501_v17 }
 0x1df   :  { %v535_v56 = vadd.f32 %v534_v52, %v507_v51  ;;  %v728_v61 = vpop.eup %727  ;;  %v513_v3 = vmul.f32 0.6931472, %v726_v6  ;;  %747 = vlog2.f32 %v555_v45 }
 0x1e0   :  { %v730_v4 = vpop.eup %729  ;;  %v515_v7 = vmul.f32 0.6931472, %v728_v61 }
 0x1e1   :  { %v536_v60 = vadd.f32 %v535_v56, %v509_v55  ;;  %v732_v11 = vpop.eup %731  ;;  %v517_v12 = vmul.f32 0.6931472, %v730_v4 }
 0x1e2   :  { %v734_v15 = vpop.eup %733  ;;  %v519_v18 = vmul.f32 0.6931472, %v732_v11 }
 0x1e3   :  { %v537_v9 = vadd.f32 %v536_v60, %v511_v59  ;;  %v736_v25 = vpop.eup %735  ;;  %v521_v19 = vmul.f32 0.6931472, %v734_v15 }
 0x1e4   :  { %v738_v33 = vpop.eup %737  ;;  %v523_v23 = vmul.f32 0.6931472, %v736_v25 }
 0x1e5   :  { %v538_v10 = vadd.f32 %v537_v9, %v513_v3  ;;  %v740_v22 = vpop.eup %739  ;;  %v525_v28 = vmul.f32 0.6931472, %v738_v33 }
 0x1e6   :  { %v742_v29 = vpop.eup %741  ;;  %v527_v30 = vmul.f32 0.6931472, %v740_v22 }
 0x1e7   :  { %v539_v14 = vadd.f32 %v538_v10, %v515_v7  ;;  %v744_v58 = vpop.eup %743  ;;  %v529_v47 = vmul.f32 0.6931472, %v742_v29 }
 0x1e8   :  { %v746_v49 = vpop.eup %745  ;;  %v531_v36 = vmul.f32 0.6931472, %v744_v58 }
 0x1e9   :  { %v540_v24 = vadd.f32 %v539_v14, %v517_v12  ;;  %v533_v37 = vmul.f32 0.6931472, %v746_v49  ;;  %v748_v26 = vpop.eup %747 }
 0x1ea   :  { %v557_v34 = vmul.f32 0.6931472, %v748_v26 }
 0x1eb   :  { %v541_v21 = vadd.f32 %v540_v24, %v519_v18 }
 0x1ed   :  { %v542_v39 = vadd.f32 %v541_v21, %v521_v19 }
 0x1ef   :  { %v543_v41 = vadd.f32 %v542_v39, %v523_v23 }
 0x1f1   :  { %v544_v32 = vadd.f32 %v543_v41, %v525_v28 }
 0x1f3   :  { %v545_v1 = vadd.f32 %v544_v32, %v527_v30 }
 0x1f5   :  { %v546_v57 = vadd.f32 %v545_v1, %v529_v47 }
 0x1f7   :  { %v547_v62 = vadd.f32 %v546_v57, %v531_v36 }
 0x1f9   :  { %v548_v38 = vadd.f32 %v547_v62, %v533_v37 }
 0x1fb   :  { %v549_v16 = vrot.slane %v548_v38, 4 }
 0x1fd   :  { %v550_v13 = vadd.f32 %v549_v16, %v548_v38 }
 0x1ff   :  { %v551_v40 = vrot.slane %v550_v13, 2 }
 0x201   :  { %v552_v20 = vadd.f32 %v551_v40, %v550_v13 }
 0x203   :  { %v553_v42 = vrot.slane %v552_v20, 1 }
 0x205   :  { %v554_v27 = vadd.f32 %v553_v42, %v552_v20 }
 0x207   :  { %v558_v35 = vsub.f32 %v554_v27, %v557_v34 }
 0x209   :  { %559 = vadd.xlane.f32.xlu1 %v558_v35 }
 0x265   :  { %v469_v0 = vpop.xlane.xlu1 %468 }
 0x296   :  { %v560_v43 = vpop.xlane.xlu1 %559 }
 0x297   :  { %v561_v44 = vadd.f32 %v560_v43, %v469_v0 }
 0x299   :  { %v562_v31 = vsub.f32 0.0, %v561_v44 }
 0x29b   :  { %v563_v46 = vmul.f32 0.0078125, %v562_v31 }
 0x29d   :  { %565 = vst.msk [vmem:[#allocation2] sm:$0x1] %vm564_vm1, %v563_v46 }
 0x29e   :  { %760 = shalt.err (!%p757_p4)
}
 0x29f   :  { %s761_s26 = scalar_lea.hbm %s1072_s3, 16 }
 0x2a0   :  { %p762_p5 = scmp.ne.s32.totalorder %s1072_s3, %s761_s26  ;;  %p765_p6 = scmp.lt.u32.totalorder %s761_s26, %s1072_s3 }
 0x2a2   :  { %p767_p7 = pnand %p765_p6, %p762_p5 }
 0x2a4   :  { %770 = shalt.err (!%p767_p7)
}
 0x2a5   :  { %575 = dma.vmem_to_hbm [thread:$0]  %s573_s21, 16, %s1072_s3, [#allocation3]  }
 0x2a6   :  { %771 = dma.done.wait [#allocation3], 16  }
 0x2a7   :  { %772 = vsyncadd [#allocation3], 4294967280 }
 0x2a8   :  { %579 = vsyncpa [#allocation3], 1 }

</bundles_post_ra>
